<compile_context>
chip_gen: v6e
topology: v6e:2x2x1
jax: 0.10.0
libtpu: 0.0.40
codegen_flags: <defaults>
</compile_context>

<pallas_src>
import functools

import jax
import jax.numpy as jnp
from jax.experimental import pallas as pl
from jax.experimental.pallas import tpu as pltpu

SUBLANE = 8
SMALL_BATCH = 64  # below this, plain JAX beats any pallas_call launch


def _round_up(n, m):
    return ((n + m - 1) // m) * m


def policy_kernel(x_ref, w1_ref, b1_ref, w2_ref, b2_ref, o_ref):
    # fc1 (bf16 x bf16 -> f32 accumulate on the MXU) + bias + LeakyReLU(0.01).
    x = x_ref[...]
    h = jnp.dot(x, w1_ref[...], preferred_element_type=jnp.float32) + b1_ref[...]
    h = jnp.where(h > 0, h, 0.01 * h)  # f32 elementwise (VPU), v5e-safe

    # fc2: cast activations back to bf16 only for the MXU, accumulate in f32.
    logits = jnp.dot(h.astype(w2_ref.dtype), w2_ref[...],
                     preferred_element_type=jnp.float32) + b2_ref[...]

    # Numerically-stable softmax over the action (last) axis.  Output is the
    # true (un-padded) action width, so no lane masking is needed.
    m = jnp.max(logits, axis=-1, keepdims=True)
    e = jnp.exp(logits - m)
    denom = jnp.sum(e, axis=-1, keepdims=True)
    # Exact divide: denom is only (tb, 1); keeps rows summing to exactly ~1
    # for downstream multinomial sampling / log-prob accumulation.
    o_ref[...] = (e / denom).astype(o_ref.dtype)


def prepare_params(w1, b1, w2, b2, *, param_dtype=jnp.bfloat16):
    """One-time parameter prep (kept out of the per-call path).

    Expects weights already in (in_features, out_features) layout (PyTorch
    Linear stores (out, in); transpose once before calling this).  Weights go
    to bf16 (MXU-native, halves HBM reads); biases stay f32 since they are
    added after the f32 accumulation.  No lane padding -- weight blocks are
    passed as full-array shapes, which is always layout-legal.
    """
    w1p = jnp.asarray(w1, param_dtype)
    w2p = jnp.asarray(w2, param_dtype)
    b1p = jnp.asarray(b1, jnp.float32).reshape(1, -1)
    b2p = jnp.asarray(b2, jnp.float32).reshape(1, -1)
    return w1p, b1p, w2p, b2p


def _mlp_softmax_ref(x2, w1p, b1p, w2p, b2p):
    """Plain-JAX version of the same math (used for tiny batches)."""
    h = jnp.dot(x2.astype(w1p.dtype), w1p,
                preferred_element_type=jnp.float32) + b1p
    h = jnp.where(h > 0, h, 0.01 * h)
    logits = jnp.dot(h.astype(w2p.dtype), w2p,
                     preferred_element_type=jnp.float32) + b2p
    return jax.nn.softmax(logits, axis=-1)


def policy_forward(x, w1p, b1p, w2p, b2p, *, tb=512):
    """x: (input_size,) or (B, input_size) -> softmax action probs per state."""
    squeeze = x.ndim == 1
    x2 = x.reshape(1, -1) if squeeze else x
    B, in_size = x2.shape
    hidden = w1p.shape[1]
    out_size = w2p.shape[1]

    # Tiny batches (incl. the single-state REINFORCE path): plain JAX is faster
    # than any pallas_call launch + DMA.
    if B < SMALL_BATCH:
        out = _mlp_softmax_ref(x2, w1p, b1p, w2p, b2p)
        return out.reshape(out_size) if squeeze else out

    # Batch tiling: prefer large tiles (per-grid-step overhead ~0.35 us), but
    # keep >= 2 grid steps so v7x's 2 TensorCores are both used.
    b8 = _round_up(B, SUBLANE)
    tb_eff = min(tb, b8)
    if pl.cdiv(b8, tb_eff) < 2 and b8 >= 2 * SUBLANE:
        tb_eff = _round_up(pl.cdiv(b8, 2), SUBLANE)
    b_pad = _round_up(b8, tb_eff)

    x2 = x2.astype(w1p.dtype)  # bf16 on the HBM->VMEM->MXU path
    if b_pad != B:
        x2 = jnp.pad(x2, ((0, b_pad - B), (0, 0)))  # zero rows: harmless, no NaNs

    grid = (b_pad // tb_eff,)

    cost = pl.CostEstimate(
        flops=2 * b_pad * (in_size * hidden + hidden * out_size),
        transcendentals=b_pad * out_size,
        bytes_accessed=(x2.size * x2.dtype.itemsize
                        + w1p.size * w1p.dtype.itemsize
                        + w2p.size * w2p.dtype.itemsize
                        + (b1p.size + b2p.size) * 4
                        + b_pad * out_size * 4),
    )

    out = pl.pallas_call(
        policy_kernel,
        out_shape=jax.ShapeDtypeStruct((b_pad, out_size), jnp.float32),
        grid=grid,
        in_specs=[
            pl.BlockSpec((tb_eff, in_size), lambda i: (i, 0)),
            pl.BlockSpec(w1p.shape, lambda i: (0, 0)),  # full-array blocks:
            pl.BlockSpec(b1p.shape, lambda i: (0, 0)),  # resident weights
            pl.BlockSpec(w2p.shape, lambda i: (0, 0)),
            pl.BlockSpec(b2p.shape, lambda i: (0, 0)),
        ],
        out_specs=pl.BlockSpec((tb_eff, out_size), lambda i: (i, 0)),
        compiler_params=pltpu.CompilerParams(
            dimension_semantics=("parallel",)),
        cost_estimate=cost,
    )(x2, w1p, b1p, w2p, b2p)

    if b_pad != B:
        out = out[:B]
    return out


if __name__ == "__main__":
    # Small shapes consistent with the module: small state vector -> hidden ->
    # actions, batched over enough states to exercise the Pallas path
    # (grid splits into 2 parallel tiles of 128 rows).
    input_size, hidden_size, output_size = 16, 32, 8
    batch = 256

    key = jax.random.PRNGKey(0)
    kx, kw1, kb1, kw2, kb2 = jax.random.split(key, 5)

    xb = jax.random.normal(kx, (batch, input_size), dtype=jnp.float32)
    # Parameters built directly in (in_features, out_features) layout.
    w1 = jax.random.normal(kw1, (input_size, hidden_size), dtype=jnp.float32) * 0.1
    b1 = jax.random.normal(kb1, (hidden_size,), dtype=jnp.float32) * 0.1
    w2 = jax.random.normal(kw2, (hidden_size, output_size), dtype=jnp.float32) * 0.1
    b2 = jax.random.normal(kb2, (output_size,), dtype=jnp.float32) * 0.1

    # One-time parameter prep (bf16 weights, f32 biases).
    w1p, b1p, w2p, b2p = prepare_params(w1, b1, w2, b2)

    fwd = jax.jit(policy_forward)
    probs = jax.block_until_ready(fwd(xb, w1p, b1p, w2p, b2p))

    # Plain-JAX reference using the same bf16-rounded operands (so tolerances
    # measure kernel correctness, not quantization).
    w1f = w1p.astype(jnp.float32)
    w2f = w2p.astype(jnp.float32)
    xf = xb.astype(jnp.bfloat16).astype(jnp.float32)
    h_ref = xf @ w1f + b1p
    h_ref = jnp.where(h_ref > 0, h_ref, 0.01 * h_ref)
    h_ref = h_ref.astype(jnp.bfloat16).astype(jnp.float32)
    ref = jax.nn.softmax(h_ref @ w2f + b2p, axis=-1)

    assert probs.shape == (batch, output_size)
    assert jnp.allclose(probs, ref, atol=2e-3, rtol=2e-3), "mismatch vs reference"
    assert jnp.allclose(jnp.sum(probs, axis=-1), 1.0, atol=1e-3), "rows don't sum to 1"

    # Single-state path (matches the original module's Softmax(dim=0) on a 1-D
    # state vector); tiny batches route to plain JAX by design.
    p1 = jax.block_until_ready(policy_forward(xb[0], w1p, b1p, w2p, b2p))
    assert p1.shape == (output_size,)
    assert jnp.allclose(p1, ref[0], atol=2e-3, rtol=2e-3), "single-state mismatch"

    print("KERNEL_OK")
</pallas_src>

<mosaic_0001>
module attributes {stable_mosaic.version = 11 : i64} {
  func.func @policy_kernel(%arg0: i32, %arg1: memref<128x16xbf16, #tpu.memory_space<vmem>>, %arg2: memref<16x32xbf16, #tpu.memory_space<vmem>>, %arg3: memref<1x32xf32, #tpu.memory_space<vmem>>, %arg4: memref<32x8xbf16, #tpu.memory_space<vmem>>, %arg5: memref<1x8xf32, #tpu.memory_space<vmem>>, %arg6: memref<128x8xf32, #tpu.memory_space<vmem>>) attributes {dimension_semantics = [#tpu.dimension_semantics<parallel>], iteration_bounds = array<i64: 2>, scalar_prefetch = 0 : i64, scratch_operands = 0 : i64, tpu.core_type = #tpu.core_type<tc>, window_params = [{transform_indices = @transform_0, window_bounds = array<i64: 128, 16>}, {pipeline_mode = #tpu.pipeline_mode<synchronous>, transform_indices = @transform_1, window_bounds = array<i64: 16, 32>}, {pipeline_mode = #tpu.pipeline_mode<synchronous>, transform_indices = @transform_2, window_bounds = array<i64: 1, 32>}, {pipeline_mode = #tpu.pipeline_mode<synchronous>, transform_indices = @transform_3, window_bounds = array<i64: 32, 8>}, {pipeline_mode = #tpu.pipeline_mode<synchronous>, transform_indices = @transform_4, window_bounds = array<i64: 1, 8>}, {transform_indices = @transform_5, window_bounds = array<i64: 128, 8>}]} {
    %c0 = arith.constant 0 : index
    %c0_0 = arith.constant 0 : index
    %0 = vector.load %arg1[%c0, %c0_0] : memref<128x16xbf16, #tpu.memory_space<vmem>>, vector<128x16xbf16>
    %c0_1 = arith.constant 0 : index
    %c0_2 = arith.constant 0 : index
    %1 = vector.load %arg2[%c0_1, %c0_2] : memref<16x32xbf16, #tpu.memory_space<vmem>>, vector<16x32xbf16>
    %cst = arith.constant dense<0.000000e+00> : vector<128x32xf32>
    %2 = tpu.matmul %0, %1, %cst {dimension_numbers = #tpu.dot_dimension_numbers<[1], [0], [0], [1], [0, 0, 1, 1], [], []>} : vector<128x16xbf16>, vector<16x32xbf16>, vector<128x32xf32> -> vector<128x32xf32>
    %c0_3 = arith.constant 0 : index
    %c0_4 = arith.constant 0 : index
    %3 = vector.load %arg3[%c0_3, %c0_4] : memref<1x32xf32, #tpu.memory_space<vmem>>, vector<1x32xf32>
    %4 = vector.broadcast %3 : vector<1x32xf32> to vector<128x32xf32>
    %5 = arith.addf %2, %4 : vector<128x32xf32>
    %cst_5 = arith.constant 0.000000e+00 : f32
    %6 = vector.broadcast %cst_5 : f32 to vector<128x32xf32>
    %7 = arith.cmpf ogt, %5, %6 : vector<128x32xf32>
    %cst_6 = arith.constant 0.00999999977 : f32
    %8 = vector.broadcast %cst_6 : f32 to vector<128x32xf32>
    %9 = arith.mulf %8, %5 : vector<128x32xf32>
    %10 = arith.select %7, %5, %9 : vector<128x32xi1>, vector<128x32xf32>
    %11 = arith.truncf %10 : vector<128x32xf32> to vector<128x32xbf16>
    %c0_7 = arith.constant 0 : index
    %c0_8 = arith.constant 0 : index
    %12 = vector.load %arg4[%c0_7, %c0_8] : memref<32x8xbf16, #tpu.memory_space<vmem>>, vector<32x8xbf16>
    %cst_9 = arith.constant dense<0.000000e+00> : vector<128x8xf32>
    %13 = tpu.matmul %11, %12, %cst_9 {dimension_numbers = #tpu.dot_dimension_numbers<[1], [0], [0], [1], [0, 0, 1, 1], [], []>} : vector<128x32xbf16>, vector<32x8xbf16>, vector<128x8xf32> -> vector<128x8xf32>
    %c0_10 = arith.constant 0 : index
    %c0_11 = arith.constant 0 : index
    %14 = vector.load %arg5[%c0_10, %c0_11] : memref<1x8xf32, #tpu.memory_space<vmem>>, vector<1x8xf32>
    %15 = vector.broadcast %14 : vector<1x8xf32> to vector<128x8xf32>
    %16 = arith.addf %13, %15 : vector<128x8xf32>
    %cst_12 = arith.constant dense<0xFF800000> : vector<128xf32>
    %17 = vector.multi_reduction <maximumf>, %16, %cst_12 [1] : vector<128x8xf32> to vector<128xf32>
    %18 = vector.shape_cast %17 : vector<128xf32> to vector<128x1xf32>
    %19 = vector.broadcast %18 : vector<128x1xf32> to vector<128x8xf32>
    %20 = arith.subf %16, %19 : vector<128x8xf32>
    %21 = math.exp %20 : vector<128x8xf32>
    %cst_13 = arith.constant dense<0.000000e+00> : vector<128xf32>
    %22 = vector.multi_reduction <add>, %21, %cst_13 [1] : vector<128x8xf32> to vector<128xf32>
    %23 = vector.shape_cast %22 : vector<128xf32> to vector<128x1xf32>
    %24 = vector.broadcast %23 : vector<128x1xf32> to vector<128x8xf32>
    %25 = arith.divf %21, %24 : vector<128x8xf32>
    %c0_14 = arith.constant 0 : index
    %c0_15 = arith.constant 0 : index
    %26 = vector.load %arg6[%c0_14, %c0_15] : memref<128x8xf32, #tpu.memory_space<vmem>>, vector<128x8xf32>
    tpu.vector_store %arg6[%c0_14, %c0_15], %25 {strides = array<i32>} : memref<128x8xf32, #tpu.memory_space<vmem>>, vector<128x8xf32>,
    return
  }
  func.func @transform_0(%arg0: i32) -> (i32, i32) {
    %c0_i32 = arith.constant 0 : i32
    %c0_i32_0 = arith.constant 0 : i32
    return %arg0, %c0_i32 : i32, i32
  }
  func.func @transform_1(%arg0: i32) -> (i32, i32) {
    %c0_i32 = arith.constant 0 : i32
    %c0_i32_0 = arith.constant 0 : i32
    %c0_i32_1 = arith.constant 0 : i32
    return %c0_i32, %c0_i32_0 : i32, i32
  }
  func.func @transform_2(%arg0: i32) -> (i32, i32) {
    %c0_i32 = arith.constant 0 : i32
    %c0_i32_0 = arith.constant 0 : i32
    %c0_i32_1 = arith.constant 0 : i32
    return %c0_i32, %c0_i32_0 : i32, i32
  }
  func.func @transform_3(%arg0: i32) -> (i32, i32) {
    %c0_i32 = arith.constant 0 : i32
    %c0_i32_0 = arith.constant 0 : i32
    %c0_i32_1 = arith.constant 0 : i32
    return %c0_i32, %c0_i32_0 : i32, i32
  }
  func.func @transform_4(%arg0: i32) -> (i32, i32) {
    %c0_i32 = arith.constant 0 : i32
    %c0_i32_0 = arith.constant 0 : i32
    %c0_i32_1 = arith.constant 0 : i32
    return %c0_i32, %c0_i32_0 : i32, i32
  }
  func.func @transform_5(%arg0: i32) -> (i32, i32) {
    %c0_i32 = arith.constant 0 : i32
    %c0_i32_0 = arith.constant 0 : i32
    return %arg0, %c0_i32 : i32, i32
  }
}

</mosaic_0001>

<bundles_post_ra>
// kernel: policy_forward.1
= control target key start
LH: loop header
LB: loop body
LE: loop exit
PB: predicated region body
PF: predicated region fallthrough
CT: control target
= control target key end

     0   :  { %s1090_s18 = smov 0   ;;  %s1354_s0 = inlined_call_operand.vmem [shape: bf16[256,16], index: 0, kind: input, shape index: {}]   ;;  %s1355_s1 = inlined_call_operand.vmem [shape: bf16[16,32], index: 1, kind: input, shape index: {}]   ;;  %s1356_s2 = inlined_call_operand.vmem [shape: f32[1,32], index: 2, kind: input, shape index: {}]   ;;  %s1357_s3 = inlined_call_operand.vmem [shape: bf16[32,8], index: 3, kind: input, shape index: {}]   ;;  %s1358_s4 = inlined_call_operand.vmem [shape: f32[1,8], index: 4, kind: input, shape index: {}]   ;;  %s1359_s5 = inlined_call_operand.vmem [shape: f32[256,8], index: 5, kind: output, shape index: {}]  }
   0x1 LB: > { %s872_s19 = sadd.s32 4294967295, %s1058_s18   ;;  %p876_p0 = scmp.ge.s32.totalorder %s1058_s18, 1  ;;  %s1058_s18 = sphi %s1090_s18, %s15_s18  }
   0x2   : > { %p188_p1 = scmp.lt.s32.totalorder %s1058_s18, 3 }
   0x4   : > { %p189_p2 = pnand %p876_p0, %p188_p1 }
   0x5   : > { %s877_s22 = sshll.u32 (!%p189_p2), %s872_s19, 4 }
   0x6   : > { %192 = sbr.rel (%p189_p2) target bundleno = 765 (0x2fd), region = 40  ;;  %p217_p3 = scmp.lt.s32.totalorder (!%p189_p2), %s877_s22, 31 }
   0xb   : > { %v977_v0 = vld [vmem:[%s1355_s1] sm:$0xff]   ;;  %s1361_s22 = smov (!%p217_p3, %s877_s22), 31  ;;  %vm300_vm0 = vcmask 130048   ;;  %v986_v9 = vld [vmem:[%s1357_s3 + $0x8] sm:$0xff]   ;;  %vm501_vm5 = vcmask 261120  }
   0xc   : > { %931 = vmatprep.subr.bf16.mxu0 %v977_v0  ;;  %s878_s23 = sshll.u32 %s1361_s22, 2  ;;  %949 = vmatprep.subr.bf16.mxu1 %v986_v9  ;;  %v987_v10 = vld [vmem:[%s1357_s3] sm:$0xff]   ;;  %s880_s10 = sshll.u32 %s1361_s22, 3 }
   0xd   : > { %932 = vmatpush3.bf16.msra.mxu0 %v977_v0  ;;  %s220_s26 = scalar_lea.vmem %s1354_s0, %s878_s23  ;;  %950 = vmatpush3.bf16.msra.mxu1 %v986_v9  ;;  %v1124_v12 = vld [vmem:[%s1356_s2] ss:$0 sm:$0xff]  ;;  %s1301_s13 = scalar_lea.vmem %s1359_s5, %s880_s10 }
   0xe   : > { %v978_v1 = vld [vmem:[%s220_s26] sm:$0xff]   ;;  %v979_v2 = vld [vmem:[%s220_s26 + $0x8] sm:$0xff]   ;;  %v980_v3 = vld [vmem:[%s220_s26 + $0x10] sm:$0xff]   ;;  %951 = vmatprep.subr.bf16.mxu1 %v987_v10 }
   0xf   : > { %933 = vmatprep.mubr.msk.bf16.mxu0 %vm300_vm0, %v978_v1  ;;  %v981_v4 = vld [vmem:[%s220_s26 + $0x18] sm:$0xff]   ;;  %v982_v5 = vld [vmem:[%s220_s26 + $0x20] sm:$0xff]   ;;  %v983_v6 = vld [vmem:[%s220_s26 + $0x28] sm:$0xff]  }
  0x10   : > { %934 = vmatmul.mubr.msk.bf16.vlgmr.msra.gmra.mxu0 %vm300_vm0, %v979_v2  ;;  %v984_v7 = vld [vmem:[%s220_s26 + $0x30] sm:$0xff]   ;;  %v985_v8 = vld [vmem:[%s220_s26 + $0x38] sm:$0xff]  }
  0x11   : > { %937 = vmatprep.mubr.msk.bf16.mxu0 %vm300_vm0, %v980_v3  ;;  %952 = vmatpush3.bf16.msra.mxu1 %v987_v10 }
  0x18   : > { %938 = vmatmul.mubr.msk.bf16.gmra.mxu0 %vm300_vm0, %v981_v4 }
  0x19   : > { %941 = vmatprep.mubr.msk.bf16.mxu0 %vm300_vm0, %v982_v5 }
  0x20   : > { %942 = vmatmul.mubr.msk.bf16.gmra.mxu0 %vm300_vm0, %v983_v6 }
  0x21   : > { %945 = vmatprep.mubr.msk.bf16.mxu0 %vm300_vm0, %v984_v7 }
  0x28   : > { %946 = vmatmul.mubr.msk.bf16.gmra.mxu0 %vm300_vm0, %v985_v8 }
  0xd0   : > { %v935_v11 = vpop.f32.mrf.mxu0 }
  0xd1   : > { %v368_v15 = vadd.f32 %v935_v11, %v1124_v12 }
  0xd2   : > { %v359_v13 = vpop.f32.mrf.mxu0 }
  0xd3   : > { %v360_v14 = vadd.f32 %v1124_v12, %v359_v13  ;;  %v440_v22 = vmul.f32 0.01, %v368_v15  ;;  %vm424_vm3 = vcmp.gt.f32.partialorder %v368_v15, 0.0 }
  0xd4   : > { %v936_v16 = vpop.f32.mrf.mxu0 }
  0xd5   : > { %v371_v17 = vadd.f32 %v936_v16, %v1124_v12  ;;  %v438_v19 = vmul.f32 0.01, %v360_v14  ;;  %vm422_vm2 = vcmp.gt.f32.partialorder %v360_v14, 0.0  ;;  %v456_v30 = vsel %vm424_vm3, %v368_v15, %v440_v22 }
  0xd6   : > { %v362_v18 = vpop.f32.mrf.mxu0 }
  0xd7   : > { %vm425_vm1 = vcmp.gt.f32.partialorder %v371_v17, 0.0  ;;  %v441_v20 = vmul.f32 0.01, %v371_v17  ;;  %v363_v21 = vadd.f32 %v1124_v12, %v362_v18  ;;  %v454_v28 = vsel %vm422_vm2, %v360_v14, %v438_v19 }
  0xd8   : > { %v939_v23 = vpop.f32.mrf.mxu0  ;;  %vm623_vm2 = vcmask 64512  }
  0xd9   : > { %v439_v24 = vmul.f32 0.01, %v363_v21  ;;  %vm423_vm4 = vcmp.gt.f32.partialorder %v363_v21, 0.0  ;;  %v457_v25 = vsel %vm425_vm1, %v371_v17, %v441_v20  ;;  %v384_v31 = vadd.f32 %v939_v23, %v1124_v12 }
  0xda   : > { %v375_v26 = vpop.f32.mrf.mxu0  ;;  %v471_v34 = vpack.c.bf16 %v457_v25, %v456_v30 }
  0xdb   : > { %v376_v27 = vadd.f32 %v1124_v12, %v375_v26  ;;  %v455_v29 = vsel %vm423_vm4, %v363_v21, %v439_v24  ;;  %v444_v40 = vmul.f32 0.01, %v384_v31  ;;  %vm428_vm8 = vcmp.gt.f32.partialorder %v384_v31, 0.0 }
  0xdc   : > { %v940_v32 = vpop.f32.mrf.mxu0  ;;  %v470_v33 = vpack.c.bf16 %v455_v29, %v454_v28 }
  0xdd   : > { %v387_v35 = vadd.f32 %v940_v32, %v1124_v12  ;;  %v442_v37 = vmul.f32 0.01, %v376_v27  ;;  %vm426_vm7 = vcmp.gt.f32.partialorder %v376_v27, 0.0  ;;  %v460_v48 = vsel %vm428_vm8, %v384_v31, %v444_v40 }
  0xde   : > { %v378_v36 = vpop.f32.mrf.mxu0  ;;  %953 = vmatprep.mubr.msk.bf16.mxu1 %vm501_vm5, %v470_v33 }
  0xdf   : > { %vm429_vm6 = vcmp.gt.f32.partialorder %v387_v35, 0.0  ;;  %v445_v38 = vmul.f32 0.01, %v387_v35  ;;  %v379_v39 = vadd.f32 %v1124_v12, %v378_v36  ;;  %954 = vmatmul.mubr.msk.bf16.vlgmr.msra.gmra.mxu1 %vm501_vm5, %v471_v34  ;;  %v458_v45 = vsel %vm426_vm7, %v376_v27, %v442_v37 }
  0xe0   : > { %v943_v41 = vpop.f32.mrf.mxu0 }
  0xe1   : > { %vm427_vm9 = vcmp.gt.f32.partialorder %v379_v39, 0.0  ;;  %v443_v42 = vmul.f32 0.01, %v379_v39  ;;  %v461_v43 = vsel %vm429_vm6, %v387_v35, %v445_v38  ;;  %v400_v50 = vadd.f32 %v943_v41, %v1124_v12 }
  0xe2   : > { %v391_v44 = vpop.f32.mrf.mxu0  ;;  %v473_v52 = vpack.c.bf16 %v461_v43, %v460_v48 }
  0xe3   : > { %v459_v46 = vsel %vm427_vm9, %v379_v39, %v443_v42  ;;  %v392_v47 = vadd.f32 %v1124_v12, %v391_v44  ;;  %v448_v58 = vmul.f32 0.01, %v400_v50  ;;  %vm432_vm12 = vcmp.gt.f32.partialorder %v400_v50, 0.0 }
  0xe4   : > { %v472_v49 = vpack.c.bf16 %v459_v46, %v458_v45  ;;  %v944_v51 = vpop.f32.mrf.mxu0 }
  0xe5   : > { %v403_v53 = vadd.f32 %v944_v51, %v1124_v12  ;;  %v446_v55 = vmul.f32 0.01, %v392_v47  ;;  %vm430_vm11 = vcmp.gt.f32.partialorder %v392_v47, 0.0  ;;  %v464_v2 = vsel %vm432_vm12, %v400_v50, %v448_v58 }
  0xe6   : > { %v394_v54 = vpop.f32.mrf.mxu0  ;;  %957 = vmatprep.mubr.msk.bf16.mxu1 %vm501_vm5, %v472_v49 }
  0xe7   : > { %vm433_vm10 = vcmp.gt.f32.partialorder %v403_v53, 0.0  ;;  %v449_v56 = vmul.f32 0.01, %v403_v53  ;;  %v395_v57 = vadd.f32 %v1124_v12, %v394_v54  ;;  %958 = vmatmul.mubr.msk.bf16.gmra.mxu1 %vm501_vm5, %v473_v52  ;;  %v462_v63 = vsel %vm430_vm11, %v392_v47, %v446_v55 }
  0xe8   : > { %v947_v59 = vpop.f32.mrf.mxu0 }
  0xe9   : > { %vm431_vm13 = vcmp.gt.f32.partialorder %v395_v57, 0.0  ;;  %v447_v60 = vmul.f32 0.01, %v395_v57  ;;  %v465_v61 = vsel %vm433_vm10, %v403_v53, %v449_v56  ;;  %v416_v4 = vadd.f32 %v947_v59, %v1124_v12 }
  0xea   : > { %v407_v62 = vpop.f32.mrf.mxu0  ;;  %v475_v6 = vpack.c.bf16 %v465_v61, %v464_v2 }
  0xeb   : > { %v463_v0 = vsel %vm431_vm13, %v395_v57, %v447_v60  ;;  %v408_v1 = vadd.f32 %v1124_v12, %v407_v62  ;;  %v452_v13 = vmul.f32 0.01, %v416_v4  ;;  %vm436_vm0 = vcmp.gt.f32.partialorder %v416_v4, 0.0 }
  0xec   : > { %v474_v3 = vpack.c.bf16 %v463_v0, %v462_v63  ;;  %v948_v5 = vpop.f32.mrf.mxu0 }
  0xed   : > { %v419_v7 = vadd.f32 %v948_v5, %v1124_v12  ;;  %v450_v9 = vmul.f32 0.01, %v408_v1  ;;  %vm434_vm15 = vcmp.gt.f32.partialorder %v408_v1, 0.0  ;;  %v468_v18 = vsel %vm436_vm0, %v416_v4, %v452_v13 }
  0xee   : > { %v410_v8 = vpop.f32.mrf.mxu0  ;;  %961 = vmatprep.mubr.msk.bf16.mxu1 %vm501_vm5, %v474_v3 }
  0xef   : > { %vm437_vm14 = vcmp.gt.f32.partialorder %v419_v7, 0.0  ;;  %v453_v10 = vmul.f32 0.01, %v419_v7  ;;  %v411_v11 = vadd.f32 %v1124_v12, %v410_v8  ;;  %962 = vmatmul.mubr.msk.bf16.gmra.mxu1 %vm501_vm5, %v475_v6  ;;  %v466_v16 = vsel %vm434_vm15, %v408_v1, %v450_v9  ;;  %v899_v12 = vld [vmem:[%s1358_s4] ss:$0 sm:$0xff] }
  0xf1   : > { %vm435_vm1 = vcmp.gt.f32.partialorder %v411_v11, 0.0  ;;  %v451_v14 = vmul.f32 0.01, %v411_v11  ;;  %v469_v15 = vsel %vm437_vm14, %v419_v7, %v453_v10 }
  0xf2   : > { %v477_v20 = vpack.c.bf16 %v469_v15, %v468_v18 }
  0xf3   : > { %v467_v17 = vsel %vm435_vm1, %v411_v11, %v451_v14 }
  0xf4   : > { %v476_v19 = vpack.c.bf16 %v467_v17, %v466_v16 }
  0xf6   : > { %965 = vmatprep.mubr.msk.bf16.mxu1 %vm501_vm5, %v476_v19 }
  0xf7   : > { %966 = vmatmul.mubr.msk.bf16.gmra.mxu1 %vm501_vm5, %v477_v20 }
 0x19f   : > { %v955_v21 = vpop.f32.mrf.mxu1 }
 0x1a0   : > { %v1153_v22 = vadd.f32 %v955_v21, %v899_v12 }
 0x1a1   : > { %v560_v23 = vpop.f32.mrf.mxu1 }
 0x1a2   : > { %v1155_v24 = vadd.f32 %v899_v12, %v560_v23  ;;  %v630_v25 = vsel %vm623_vm2, %v1153_v22, -inf }
 0x1a3   : > { %631 = vmax.xlane.f32.xlu1 %v630_v25  ;;  %v956_v26 = vpop.f32.mrf.mxu1 }
 0x1a4   : > { %v1159_v27 = vadd.f32 %v956_v26, %v899_v12  ;;  %v624_v28 = vsel %vm623_vm2, %v1155_v24, -inf }
 0x1a5   : > { %v563_v29 = vpop.f32.mrf.mxu1  ;;  %625 = vmax.xlane.f32.xlu0 %v624_v28 }
 0x1a6   : > { %v1163_v30 = vadd.f32 %v899_v12, %v563_v29  ;;  %v633_v31 = vsel %vm623_vm2, %v1159_v27, -inf }
 0x1a7   : > { %634 = vmax.xlane.f32.xlu1 %v633_v31  ;;  %v959_v32 = vpop.f32.mrf.mxu1 }
 0x1a8   : > { %v1167_v33 = vadd.f32 %v959_v32, %v899_v12  ;;  %v627_v34 = vsel %vm623_vm2, %v1163_v30, -inf }
 0x1a9   : > { %v576_v35 = vpop.f32.mrf.mxu1  ;;  %628 = vmax.xlane.f32.xlu0 %v627_v34 }
 0x1aa   : > { %v1171_v37 = vadd.f32 %v899_v12, %v576_v35  ;;  %v642_v39 = vsel %vm623_vm2, %v1167_v33, -inf }
 0x1ab   : > { %v960_v36 = vpop.f32.mrf.mxu1 }
 0x1ac   : > { %v1173_v38 = vadd.f32 %v960_v36, %v899_v12  ;;  %v636_v45 = vsel %vm623_vm2, %v1171_v37, -inf }
 0x1ad   : > { %v579_v40 = vpop.f32.mrf.mxu1  ;;  %643 = vmax.xlane.f32.xlu0 %v642_v39 }
 0x1ae   : > { %v1177_v41 = vadd.f32 %v899_v12, %v579_v40  ;;  %v645_v42 = vsel %vm623_vm2, %v1173_v38, -inf }
 0x1af   : > { %646 = vmax.xlane.f32.xlu1 %v645_v42  ;;  %v963_v43 = vpop.f32.mrf.mxu1 }
 0x1b0   : > { %v1181_v44 = vadd.f32 %v963_v43, %v899_v12  ;;  %v639_v47 = vsel %vm623_vm2, %v1177_v41, -inf }
 0x1b1   : > { %v592_v46 = vpop.f32.mrf.mxu1  ;;  %637 = vmax.xlane.f32.xlu0 %v636_v45 }
 0x1b2   : > { %v1187_v49 = vadd.f32 %v899_v12, %v592_v46  ;;  %v654_v51 = vsel %vm623_vm2, %v1181_v44, -inf }
 0x1b3   : > { %v964_v48 = vpop.f32.mrf.mxu1  ;;  %640 = vmax.xlane.f32.xlu1 %v639_v47 }
 0x1b4   : > { %v1189_v50 = vadd.f32 %v964_v48, %v899_v12  ;;  %v648_v56 = vsel %vm623_vm2, %v1187_v49, -inf }
 0x1b5   : > { %v595_v52 = vpop.f32.mrf.mxu1  ;;  %655 = vmax.xlane.f32.xlu0 %v654_v51 }
 0x1b6   : > { %v1193_v53 = vadd.f32 %v899_v12, %v595_v52  ;;  %v657_v54 = vsel %vm623_vm2, %v1189_v50, -inf }
 0x1b7   : > { %v967_v55 = vpop.f32.mrf.mxu1  ;;  %658 = vmax.xlane.f32.xlu1 %v657_v54 }
 0x1b8   : > { %v651_v59 = vsel %vm623_vm2, %v1193_v53, -inf  ;;  %v1203_v61 = vadd.f32 %v967_v55, %v899_v12 }
 0x1b9   : > { %v608_v57 = vpop.f32.mrf.mxu1  ;;  %649 = vmax.xlane.f32.xlu0 %v648_v56 }
 0x1ba   : > { %v1199_v58 = vadd.f32 %v899_v12, %v608_v57  ;;  %v666_v3 = vsel %vm623_vm2, %v1203_v61, -inf }
 0x1bb   : > { %v968_v60 = vpop.f32.mrf.mxu1  ;;  %652 = vmax.xlane.f32.xlu1 %v651_v59 }
 0x1bc   : > { %v660_v62 = vsel %vm623_vm2, %v1199_v58, -inf  ;;  %v1209_v1 = vadd.f32 %v968_v60, %v899_v12 }
 0x1bd   : > { %v611_v63 = vpop.f32.mrf.mxu1  ;;  %661 = vmax.xlane.f32.xlu0 %v660_v62 }
 0x1be   : > { %v1207_v0 = vadd.f32 %v899_v12, %v611_v63  ;;  %v669_v4 = vsel %vm623_vm2, %v1209_v1, -inf }
 0x1c0   : > { %v663_v2 = vsel %vm623_vm2, %v1207_v0, -inf }
 0x1c1   : > { %664 = vmax.xlane.f32.xlu1 %v663_v2  ;;  %667 = vmax.xlane.f32.xlu0 %v666_v3 }
 0x1c5   : > { %670 = vmax.xlane.f32.xlu1 %v669_v4 }
 0x22c   : > { %v632_v5 = vpop.xlane.xlu1 %631 }
 0x22d   : > { %v674_v6 = vsub.f32 %v1153_v22, %v632_v5 }
 0x22e   : > { %v626_v7 = vpop.xlane.xlu0 %625 }
 0x22f   : > { %v692_v8 = vmul.f32 1.442695, %v674_v6  ;;  %v672_v9 = vsub.f32 %v1155_v24, %v626_v7 }
 0x230   : > { %v635_v10 = vpop.xlane.xlu1 %634 }
 0x231   : > { %988 = vpow2.f32 %v692_v8  ;;  %v688_v11 = vmul.f32 1.442695, %v672_v9  ;;  %v675_v13 = vsub.f32 %v1159_v27, %v635_v10 }
 0x232   : > { %v629_v14 = vpop.xlane.xlu0 %628 }
 0x233   : > { %990 = vpow2.f32 %v688_v11  ;;  %v694_v15 = vmul.f32 1.442695, %v675_v13  ;;  %v673_v16 = vsub.f32 %v1163_v30, %v629_v14 }
 0x235   : > { %992 = vpow2.f32 %v694_v15  ;;  %v690_v17 = vmul.f32 1.442695, %v673_v16 }
 0x236   : > { %v644_v18 = vpop.xlane.xlu0 %643 }
 0x237   : > { %994 = vpow2.f32 %v690_v17  ;;  %v678_v19 = vsub.f32 %v1167_v33, %v644_v18 }
 0x238   : > { %v647_v20 = vpop.xlane.xlu1 %646 }
 0x239   : > { %v700_v12 = vmul.f32 1.442695, %v678_v19  ;;  %v679_v21 = vsub.f32 %v1173_v38, %v647_v20 }
 0x23a   : > { %v638_v22 = vpop.xlane.xlu0 %637 }
 0x23b   : > { %996 = vpow2.f32 %v700_v12  ;;  %v702_v23 = vmul.f32 1.442695, %v679_v21  ;;  %v676_v24 = vsub.f32 %v1171_v37, %v638_v22 }
 0x23c   : > { %v641_v25 = vpop.xlane.xlu1 %640 }
 0x23d   : > { %998 = vpow2.f32 %v702_v23  ;;  %v696_v26 = vmul.f32 1.442695, %v676_v24  ;;  %v677_v27 = vsub.f32 %v1177_v41, %v641_v25 }
 0x23e   : > { %v1225_v28 = vpop.eup %988  ;;  %v656_v29 = vpop.xlane.xlu0 %655 }
 0x23f   : > { %1000 = vpow2.f32 %v696_v26  ;;  %v698_v30 = vmul.f32 1.442695, %v677_v27  ;;  %v682_v31 = vsub.f32 %v1181_v44, %v656_v29  ;;  %v726_v32 = vsel %vm623_vm2, %v1225_v28, 0.0 }
 0x240   : > { %v1230_v33 = vpop.eup %990  ;;  %v659_v34 = vpop.xlane.xlu1 %658  ;;  %727 = vadd.xlane.f32.xlu0 %v726_v32 }
 0x241   : > { %1002 = vpow2.f32 %v698_v30  ;;  %v708_v35 = vmul.f32 1.442695, %v682_v31  ;;  %v683_v36 = vsub.f32 %v1189_v50, %v659_v34  ;;  %v720_v39 = vsel %vm623_vm2, %v1230_v33, 0.0 }
 0x242   : > { %v1233_v37 = vpop.eup %992  ;;  %v650_v38 = vpop.xlane.xlu0 %649 }
 0x243   : > { %1004 = vpow2.f32 %v708_v35  ;;  %v710_v40 = vmul.f32 1.442695, %v683_v36  ;;  %v680_v41 = vsub.f32 %v1187_v49, %v650_v38  ;;  %v729_v42 = vsel %vm623_vm2, %v1233_v37, 0.0 }
 0x244   : > { %v1240_v43 = vpop.eup %994  ;;  %730 = vadd.xlane.f32.xlu1 %v729_v42  ;;  %v653_v44 = vpop.xlane.xlu1 %652  ;;  %721 = vadd.xlane.f32.xlu0 %v720_v39 }
 0x245   : > { %1006 = vpow2.f32 %v710_v40  ;;  %v704_v45 = vmul.f32 1.442695, %v680_v41  ;;  %v681_v46 = vsub.f32 %v1193_v53, %v653_v44  ;;  %v723_v49 = vsel %vm623_vm2, %v1240_v43, 0.0 }
 0x246   : > { %v662_v47 = vpop.xlane.xlu0 %661 }
 0x247   : > { %1008 = vpow2.f32 %v704_v45  ;;  %v706_v48 = vmul.f32 1.442695, %v681_v46  ;;  %v684_v50 = vsub.f32 %v1199_v58, %v662_v47 }
 0x248   : > { %v1246_v51 = vpop.eup %996  ;;  %724 = vadd.xlane.f32.xlu1 %v723_v49 }
 0x249   : > { %1010 = vpow2.f32 %v706_v48  ;;  %v712_v52 = vmul.f32 1.442695, %v684_v50  ;;  %v738_v54 = vsel %vm623_vm2, %v1246_v51, 0.0 }
 0x24a   : > { %v1250_v55 = vpop.eup %998  ;;  %v665_v56 = vpop.xlane.xlu1 %664  ;;  %739 = vadd.xlane.f32.xlu0 %v738_v54 }
 0x24b   : > { %v668_v53 = vpop.xlane.xlu0 %667  ;;  %1012 = vpow2.f32 %v712_v52  ;;  %v685_v57 = vsub.f32 %v1207_v0, %v665_v56  ;;  %v741_v59 = vsel %vm623_vm2, %v1250_v55, 0.0 }
 0x24c   : > { %v686_v58 = vsub.f32 %v1203_v61, %v668_v53  ;;  %v1256_v60 = vpop.eup %1000  ;;  %742 = vadd.xlane.f32.xlu1 %v741_v59 }
 0x24d   : > { %v714_v62 = vmul.f32 1.442695, %v685_v57  ;;  %v732_v2 = vsel %vm623_vm2, %v1256_v60, 0.0 }
 0x24e   : > { %v716_v63 = vmul.f32 1.442695, %v686_v58  ;;  %v1260_v3 = vpop.eup %1002  ;;  %v671_v4 = vpop.xlane.xlu1 %670  ;;  %733 = vadd.xlane.f32.xlu0 %v732_v2 }
 0x24f   : > { %1014 = vpow2.f32 %v714_v62  ;;  %v687_v0 = vsub.f32 %v1209_v1, %v671_v4  ;;  %v735_v61 = vsel %vm623_vm2, %v1260_v3, 0.0 }
 0x250   : > { %v1265_v5 = vpop.eup %1004  ;;  %1016 = vpow2.f32 %v716_v63  ;;  %736 = vadd.xlane.f32.xlu1 %v735_v61 }
 0x251   : > { %v718_v6 = vmul.f32 1.442695, %v687_v0  ;;  %v750_v7 = vsel %vm623_vm2, %v1265_v5, 0.0 }
 0x252   : > { %v1269_v8 = vpop.eup %1006  ;;  %751 = vadd.xlane.f32.xlu0 %v750_v7 }
 0x253   : > { %1018 = vpow2.f32 %v718_v6  ;;  %v753_v9 = vsel %vm623_vm2, %v1269_v8, 0.0 }
 0x254   : > { %v1273_v10 = vpop.eup %1008  ;;  %754 = vadd.xlane.f32.xlu1 %v753_v9 }
 0x255   : > { %v744_v1 = vsel %vm623_vm2, %v1273_v10, 0.0 }
 0x256   : > { %v1277_v11 = vpop.eup %1010  ;;  %745 = vadd.xlane.f32.xlu0 %v744_v1 }
 0x257   : > { %v747_v13 = vsel %vm623_vm2, %v1277_v11, 0.0 }
 0x258   : > { %v1281_v14 = vpop.eup %1012  ;;  %748 = vadd.xlane.f32.xlu1 %v747_v13 }
 0x259   : > { %v756_v15 = vsel %vm623_vm2, %v1281_v14, 0.0 }
 0x25a   : > { %757 = vadd.xlane.f32.xlu0 %v756_v15 }
 0x25c   : > { %v1285_v16 = vpop.eup %1014 }
 0x25d   : > { %v1287_v17 = vpop.eup %1016  ;;  %v759_v18 = vsel %vm623_vm2, %v1285_v16, 0.0 }
 0x25e   : > { %760 = vadd.xlane.f32.xlu1 %v759_v18  ;;  %v762_v19 = vsel %vm623_vm2, %v1287_v17, 0.0 }
 0x25f   : > { %763 = vadd.xlane.f32.xlu0 %v762_v19 }
 0x260   : > { %v1293_v20 = vpop.eup %1018 }
 0x261   : > { %v765_v12 = vsel %vm623_vm2, %v1293_v20, 0.0 }
 0x262   : > { %766 = vadd.xlane.f32.xlu1 %v765_v12 }
 0x2c9   : > { %v728_v21 = vpop.xlane.xlu0 %727 }
 0x2ca   : > { %1020 = vrcp.f32 %v728_v21 }
 0x2cd   : > { %v731_v22 = vpop.xlane.xlu1 %730  ;;  %v722_v23 = vpop.xlane.xlu0 %721 }
 0x2ce   : > { %1022 = vrcp.f32 %v731_v22 }
 0x2cf   : > { %1024 = vrcp.f32 %v722_v23 }
 0x2d1   : > { %v725_v24 = vpop.xlane.xlu1 %724 }
 0x2d2   : > { %1026 = vrcp.f32 %v725_v24 }
 0x2d3   : > { %v740_v25 = vpop.xlane.xlu0 %739 }
 0x2d4   : > { %1028 = vrcp.f32 %v740_v25 }
 0x2d5   : > { %v743_v26 = vpop.xlane.xlu1 %742 }
 0x2d6   : > { %1030 = vrcp.f32 %v743_v26 }
 0x2d7   : > { %v1021_v27 = vpop.eup %1020  ;;  %v734_v29 = vpop.xlane.xlu0 %733 }
 0x2d8   : > { %v773_v30 = vmul.f32 %v1021_v27, %v1225_v28  ;;  %1032 = vrcp.f32 %v734_v29 }
 0x2d9   : > { %v737_v31 = vpop.xlane.xlu1 %736 }
 0x2da   : > { %802 = vst.msk [vmem:[%s1301_s13 + $0x10] sm:$0xff] %vm623_vm2, %v773_v30  ;;  %1034 = vrcp.f32 %v737_v31 }
 0x2db   : > { %v1023_v32 = vpop.eup %1022  ;;  %v752_v34 = vpop.xlane.xlu0 %751 }
 0x2dc   : > { %v1025_v35 = vpop.eup %1024  ;;  %v775_v36 = vmul.f32 %v1023_v32, %v1233_v37  ;;  %1036 = vrcp.f32 %v752_v34 }
 0x2dd   : > { %v769_v38 = vmul.f32 %v1025_v35, %v1230_v33  ;;  %v755_v39 = vpop.xlane.xlu1 %754 }
 0x2de   : > { %803 = vst.msk [vmem:[%s1301_s13 + $0x18] sm:$0xff] %vm623_vm2, %v775_v36  ;;  %1038 = vrcp.f32 %v755_v39 }
 0x2df   : > { %v1027_v28 = vpop.eup %1026  ;;  %800 = vst.msk [vmem:[%s1301_s13] sm:$0xff] %vm623_vm2, %v769_v38  ;;  %v746_v40 = vpop.xlane.xlu0 %745 }
 0x2e0   : > { %v771_v41 = vmul.f32 %v1027_v28, %v1240_v43  ;;  %1040 = vrcp.f32 %v746_v40 }
 0x2e1   : > { %v1029_v42 = vpop.eup %1028  ;;  %v749_v44 = vpop.xlane.xlu1 %748 }
 0x2e2   : > { %801 = vst.msk [vmem:[%s1301_s13 + $0x8] sm:$0xff] %vm623_vm2, %v771_v41  ;;  %v781_v33 = vmul.f32 %v1029_v42, %v1246_v51  ;;  %1042 = vrcp.f32 %v749_v44 }
 0x2e3   : > { %v1031_v37 = vpop.eup %1030  ;;  %v758_v45 = vpop.xlane.xlu0 %757 }
 0x2e4   : > { %806 = vst.msk [vmem:[%s1301_s13 + $0x30] sm:$0xff] %vm623_vm2, %v781_v33  ;;  %v783_v46 = vmul.f32 %v1031_v37, %v1250_v55  ;;  %1044 = vrcp.f32 %v758_v45 }
 0x2e5   : > { %v1033_v47 = vpop.eup %1032 }
 0x2e6   : > { %807 = vst.msk [vmem:[%s1301_s13 + $0x38] sm:$0xff] %vm623_vm2, %v783_v46  ;;  %v777_v43 = vmul.f32 %v1033_v47, %v1256_v60 }
 0x2e7   : > { %v1035_v48 = vpop.eup %1034  ;;  %v761_v50 = vpop.xlane.xlu1 %760 }
 0x2e8   : > { %804 = vst.msk [vmem:[%s1301_s13 + $0x20] sm:$0xff] %vm623_vm2, %v777_v43  ;;  %v779_v49 = vmul.f32 %v1035_v48, %v1260_v3  ;;  %1046 = vrcp.f32 %v761_v50  ;;  %v764_v51 = vpop.xlane.xlu0 %763 }
 0x2e9   : > { %v1037_v52 = vpop.eup %1036  ;;  %1048 = vrcp.f32 %v764_v51 }
 0x2ea   : > { %805 = vst.msk [vmem:[%s1301_s13 + $0x28] sm:$0xff] %vm623_vm2, %v779_v49  ;;  %v789_v54 = vmul.f32 %v1037_v52, %v1265_v5 }
 0x2eb   : > { %v1039_v55 = vpop.eup %1038  ;;  %v767_v56 = vpop.xlane.xlu1 %766 }
 0x2ec   : > { %810 = vst.msk [vmem:[%s1301_s13 + $0x50] sm:$0xff] %vm623_vm2, %v789_v54  ;;  %v791_v53 = vmul.f32 %v1039_v55, %v1269_v8  ;;  %1050 = vrcp.f32 %v767_v56 }
 0x2ed   : > { %v1041_v57 = vpop.eup %1040 }
 0x2ee   : > { %811 = vst.msk [vmem:[%s1301_s13 + $0x58] sm:$0xff] %vm623_vm2, %v791_v53  ;;  %v785_v58 = vmul.f32 %v1041_v57, %v1273_v10 }
 0x2ef   : > { %v1043_v59 = vpop.eup %1042 }
 0x2f0   : > { %808 = vst.msk [vmem:[%s1301_s13 + $0x40] sm:$0xff] %vm623_vm2, %v785_v58  ;;  %v787_v60 = vmul.f32 %v1043_v59, %v1277_v11 }
 0x2f1   : > { %v1045_v62 = vpop.eup %1044 }
 0x2f2   : > { %809 = vst.msk [vmem:[%s1301_s13 + $0x48] sm:$0xff] %vm623_vm2, %v787_v60  ;;  %v793_v63 = vmul.f32 %v1045_v62, %v1281_v14 }
 0x2f4   : > { %812 = vst.msk [vmem:[%s1301_s13 + $0x60] sm:$0xff] %vm623_vm2, %v793_v63 }
 0x2f5   : > { %v1047_v2 = vpop.eup %1046 }
 0x2f6   : > { %v1049_v3 = vpop.eup %1048  ;;  %v795_v4 = vmul.f32 %v1047_v2, %v1285_v16 }
 0x2f7   : > { %v797_v0 = vmul.f32 %v1049_v3, %v1287_v17 }
 0x2f8   : > { %813 = vst.msk [vmem:[%s1301_s13 + $0x68] sm:$0xff] %vm623_vm2, %v795_v4 }
 0x2f9   : > { %v1051_v61 = vpop.eup %1050  ;;  %814 = vst.msk [vmem:[%s1301_s13 + $0x70] sm:$0xff] %vm623_vm2, %v797_v0 }
 0x2fa   : > { %v799_v5 = vmul.f32 %v1051_v61, %v1293_v20 }
 0x2fc   : > { %815 = vst.msk [vmem:[%s1301_s13 + $0x78] sm:$0xff] %vm623_vm2, %v799_v5 }
 0x2fd PF: > { %s15_s18 = sadd.s32 1, %s1058_s18  }
 0x2fe   : > { %p12_p4 = scmp.ge.s32.totalorder %s15_s18, 4  }
 0x300   :  { %14 = sbr.rel (!%p12_p4) target bundleno = 1 (0x1), region = 70 }

</bundles_post_ra>
